<compile_context>
chip_gen: v7x
topology: tpu7x:2x2x1
jax: 0.10.0
libtpu: 0.0.40
codegen_flags: <defaults>
</compile_context>

<pallas_src>
import functools

import numpy as np
import jax
import jax.numpy as jnp
from jax.experimental import pallas as pl
from jax.experimental.pallas import tpu as pltpu

LANES = 128


# ---------------------------------------------------------------------------
# Init-time glue: build the tone-curve LUT (the PyTorch __init__ does this
# with scipy.interpolate.interp1d(kind='cubic')).
# TODO(synk): scipy interp1d(kind='cubic') uses not-a-knot boundary conditions;
# a natural cubic spline is used here for the synthetic, init-time table only.
# ---------------------------------------------------------------------------
def _natural_cubic_spline(xk, yk, xq):
    xk = np.asarray(xk, dtype=np.float64)
    yk = np.asarray(yk, dtype=np.float64)
    n = xk.shape[0]
    h = np.diff(xk)
    A = np.zeros((n, n), dtype=np.float64)
    rhs = np.zeros(n, dtype=np.float64)
    A[0, 0] = 1.0
    A[-1, -1] = 1.0
    for i in range(1, n - 1):
        A[i, i - 1] = h[i - 1]
        A[i, i] = 2.0 * (h[i - 1] + h[i])
        A[i, i + 1] = h[i]
        rhs[i] = 3.0 * ((yk[i + 1] - yk[i]) / h[i] - (yk[i] - yk[i - 1]) / h[i - 1])
    c = np.linalg.solve(A, rhs)
    b = (np.diff(yk) / h) - h * (2.0 * c[:-1] + c[1:]) / 3.0
    d = (c[1:] - c[:-1]) / (3.0 * h)
    a = yk[:-1]
    idx = np.clip(np.searchsorted(xk, xq, side="right") - 1, 0, n - 2)
    t = xq - xk[idx]
    return a[idx] + b[idx] * t + c[idx] * t * t + d[idx] * t ** 3


def build_tone_lut(tone_curve_x, tone_curve_y, delta):
    """Returns yi (float32) of shape (int(1/delta + 1),), pre-clamped to [0,1].

    Clamping the table once is mathematically identical to the module's final
    clamp_(0,1) on every looked-up value, so the kernel can skip that clamp.
    (yi_inv / reverse() path omitted — only forward() is implemented.)
    """
    num = int(round(1.0 / delta)) + 1
    xi = np.linspace(0.0, 1.0, num=num, endpoint=True)
    yi = _natural_cubic_spline(tone_curve_x, tone_curve_y, xi)
    return np.clip(yi, 0.0, 1.0).astype(np.float32)


# ---------------------------------------------------------------------------
# Pallas kernel: clamp -> round(x * inv_delta) -> LUT gather
# ---------------------------------------------------------------------------
def tonemap_kernel(x_ref, t_ref, o_ref, *, inv_delta, lut_max, n_rows):
    x = jnp.clip(x_ref[...], 0.0, 1.0)                      # (TM, 128) f32
    idx = jnp.round(x * inv_delta).astype(jnp.int32)        # round-half-even, like torch.round
    idx = jnp.minimum(idx, lut_max)                         # never touch LUT padding (idx >= 0 already)
    hi = idx >> 7                                           # table row  (idx // 128)
    lo = idx & (LANES - 1)                                  # lane within the row

    tbl = t_ref[...]                                        # (n_rows, 128) f32, ~4 KiB resident in VMEM
    out = jnp.zeros_like(x)
    for h in range(n_rows):                                 # short static unroll (8 rows for delta=1e-3)
        src = jnp.broadcast_to(tbl[h:h + 1, :], lo.shape)   # row h replicated on every sublane
        g = jnp.take_along_axis(src, lo, axis=1)            # lane gather -> tpu.dynamic_gather
        out = jnp.where(hi == h, g, out)
    o_ref[...] = out                                        # final clamp is folded into the LUT


def tone_mapping_forward(x, yi, delta, *, tile_rows=512):
    """x: any-shape float array (e.g. NCHW). yi: (L,) float32 LUT (pre-clamped)."""
    # Keep f32 I/O: bf16 would halve HBM traffic but can shift LUT bins by +-1
    # near boundaries (see review's correctness concern), so it is not applied.
    x = x.astype(jnp.float32)
    orig_shape = x.shape
    total = x.size

    # LUT laid out as (n_rows, 128) for per-row lane gathers.
    lut_len = int(yi.shape[0])
    n_rows = -(-lut_len // LANES)
    table = jnp.pad(yi.astype(jnp.float32), (0, n_rows * LANES - lut_len))
    table = table.reshape(n_rows, LANES)

    # Lane-dense (rows, 128) slab with a single pad (one extra HBM copy at most).
    m = -(-total // LANES)                    # rows of 128 needed
    m8 = -(-m // 8) * 8                       # sublane-aligned row count
    tm = min(int(tile_rows), m8)
    if m8 // tm < 2 and m8 >= 16:             # keep >= 2 grid steps (v7x megacore)
        tm = max(8, (m8 // 2) // 8 * 8)
    mp = -(-m // tm) * tm                     # padded rows, multiple of tm
    pad = mp * LANES - total

    x_flat = x.reshape(-1)
    if pad:
        x_flat = jnp.pad(x_flat, (0, pad))
    x2 = x_flat.reshape(mp, LANES)

    kernel = functools.partial(
        tonemap_kernel,
        inv_delta=float(1.0 / delta),
        lut_max=lut_len - 1,
        n_rows=n_rows,
    )

    # VMEM budget: 2 buffers x (tm,128) f32 in + 2 x out + table
    #   = 4 * tm * 512 B + 4 KiB  (~1 MiB at tm=512) -> default scoped VMEM is
    # plenty on v5e/v6e/v7x, so no vmem_limit_bytes override is requested.
    out = pl.pallas_call(
        kernel,
        out_shape=jax.ShapeDtypeStruct((mp, LANES), jnp.float32),
        grid=(mp // tm,),
        in_specs=[
            pl.BlockSpec((tm, LANES), lambda i: (i, 0)),
            pl.BlockSpec((n_rows, LANES), lambda i: (0, 0)),
        ],
        out_specs=pl.BlockSpec((tm, LANES), lambda i: (i, 0)),
        compiler_params=pltpu.CompilerParams(
            dimension_semantics=("parallel",),
        ),
    )(x2, table)

    out_flat = out.reshape(-1)
    if pad:
        out_flat = out_flat[:total]
    return out_flat.reshape(orig_shape)


if __name__ == "__main__":
    # Deterministic synthetic tone curve + LUT (constructor args of ToneMapping).
    tone_curve_x = np.array([0.0, 0.25, 0.5, 0.75, 1.0])
    tone_curve_y = np.array([0.0, 0.35, 0.65, 0.88, 1.0])
    delta = 1e-3  # constructor arg; 1e-3 keeps the synthetic LUT at 1001 entries
    yi_np = build_tone_lut(tone_curve_x, tone_curve_y, delta)
    yi = jnp.asarray(yi_np)

    # Example input, NCHW like the PyTorch module; values outside [0,1] to
    # exercise the clamps.
    key = jax.random.PRNGKey(0)
    x = jax.random.uniform(key, (2, 4, 16, 16), dtype=jnp.float32,
                           minval=-0.2, maxval=1.2)

    out = tone_mapping_forward(x, yi, delta)
    out = jax.block_until_ready(out)

    # Pure-JAX reference of the same semantics (sanity check).
    lut_len = yi.shape[0]
    inv_delta = jnp.float32(1.0 / delta)
    xc = jnp.clip(x.astype(jnp.float32), 0.0, 1.0)
    ref_idx = jnp.clip(jnp.round(xc * inv_delta).astype(jnp.int32), 0, lut_len - 1)
    ref = jnp.take(yi, ref_idx)          # yi is pre-clamped to [0,1]

    assert out.shape == x.shape and out.dtype == jnp.float32
    np.testing.assert_allclose(np.asarray(out), np.asarray(ref), rtol=0, atol=1e-6)

    print("KERNEL_OK")
</pallas_src>

<mosaic_0001>
module attributes {stable_mosaic.version = 11 : i64} {
  func.func @tonemap_kernel(%arg0: i32, %arg1: memref<8x128xf32, #tpu.memory_space<vmem>>, %arg2: memref<8x128xf32, #tpu.memory_space<vmem>>, %arg3: memref<8x128xf32, #tpu.memory_space<vmem>>) attributes {dimension_semantics = [#tpu.dimension_semantics<parallel>], iteration_bounds = array<i64: 2>, scalar_prefetch = 0 : i64, scratch_operands = 0 : i64, tpu.core_type = #tpu.core_type<tc>, window_params = [{transform_indices = @transform_0, window_bounds = array<i64: 8, 128>}, {pipeline_mode = #tpu.pipeline_mode<synchronous>, transform_indices = @transform_1, window_bounds = array<i64: 8, 128>}, {transform_indices = @transform_2, window_bounds = array<i64: 8, 128>}]} {
    %c0 = arith.constant 0 : index
    %c0_0 = arith.constant 0 : index
    %0 = vector.load %arg1[%c0, %c0_0] : memref<8x128xf32, #tpu.memory_space<vmem>>, vector<8x128xf32>
    %cst = arith.constant 0.000000e+00 : f32
    %cst_1 = arith.constant 1.000000e+00 : f32
    %1 = vector.broadcast %cst : f32 to vector<8x128xf32>
    %2 = arith.maximumf %1, %0 : vector<8x128xf32>
    %3 = vector.broadcast %cst_1 : f32 to vector<8x128xf32>
    %4 = arith.minimumf %3, %2 : vector<8x128xf32>
    %cst_2 = arith.constant 1.000000e+03 : f32
    %5 = vector.broadcast %cst_2 : f32 to vector<8x128xf32>
    %6 = arith.mulf %4, %5 : vector<8x128xf32>
    %7 = math.roundeven %6 : vector<8x128xf32>
    %8 = arith.fptosi %7 : vector<8x128xf32> to vector<8x128xi32>
    %c1000_i32 = arith.constant 1000 : i32
    %9 = vector.broadcast %c1000_i32 : i32 to vector<8x128xi32>
    %10 = arith.minsi %8, %9 : vector<8x128xi32>
    %c7_i32 = arith.constant 7 : i32
    %11 = vector.broadcast %c7_i32 : i32 to vector<8x128xi32>
    %12 = arith.shrsi %10, %11 : vector<8x128xi32>
    %c127_i32 = arith.constant 127 : i32
    %13 = vector.broadcast %c127_i32 : i32 to vector<8x128xi32>
    %14 = arith.andi %10, %13 : vector<8x128xi32>
    %c0_3 = arith.constant 0 : index
    %c0_4 = arith.constant 0 : index
    %15 = vector.load %arg2[%c0_3, %c0_4] : memref<8x128xf32, #tpu.memory_space<vmem>>, vector<8x128xf32>
    %cst_5 = arith.constant 0.000000e+00 : f32
    %16 = vector.broadcast %cst_5 : f32 to vector<8x128xf32>
    %17 = vector.extract_strided_slice %15 {offsets = [0, 0], sizes = [1, 128], strides = [1, 1]} : vector<8x128xf32> to vector<1x128xf32>
    %18 = vector.shape_cast %17 : vector<1x128xf32> to vector<1x128xf32>
    %19 = vector.broadcast %18 : vector<1x128xf32> to vector<8x128xf32>
    %c0_i32 = arith.constant 0 : i32
    %20 = vector.broadcast %c0_i32 : i32 to vector<8x128xi32>
    %21 = arith.cmpi slt, %14, %20 : vector<8x128xi32>
    %c128_i32 = arith.constant 128 : i32
    %22 = vector.broadcast %c128_i32 : i32 to vector<8x128xi32>
    %23 = arith.addi %14, %22 : vector<8x128xi32>
    %24 = arith.select %21, %23, %14 : vector<8x128xi1>, vector<8x128xi32>
    %25 = vector.shape_cast %24 : vector<8x128xi32> to vector<8x128x1xi32>
    %26 = vector.shape_cast %25 : vector<8x128x1xi32> to vector<8x128xi32>
    %27 = tpu.dynamic_gather %19[%26] in [1] : vector<8x128xf32>, vector<8x128xi32> -> vector<8x128xf32>
    %c0_i32_6 = arith.constant 0 : i32
    %28 = vector.broadcast %c0_i32_6 : i32 to vector<8x128xi32>
    %29 = arith.cmpi eq, %12, %28 : vector<8x128xi32>
    %30 = arith.select %29, %27, %16 : vector<8x128xi1>, vector<8x128xf32>
    %31 = vector.extract_strided_slice %15 {offsets = [1, 0], sizes = [1, 128], strides = [1, 1]} : vector<8x128xf32> to vector<1x128xf32>
    %32 = vector.shape_cast %31 : vector<1x128xf32> to vector<1x128xf32>
    %33 = vector.broadcast %32 : vector<1x128xf32> to vector<8x128xf32>
    %c0_i32_7 = arith.constant 0 : i32
    %34 = vector.broadcast %c0_i32_7 : i32 to vector<8x128xi32>
    %35 = arith.cmpi slt, %14, %34 : vector<8x128xi32>
    %c128_i32_8 = arith.constant 128 : i32
    %36 = vector.broadcast %c128_i32_8 : i32 to vector<8x128xi32>
    %37 = arith.addi %14, %36 : vector<8x128xi32>
    %38 = arith.select %35, %37, %14 : vector<8x128xi1>, vector<8x128xi32>
    %39 = vector.shape_cast %38 : vector<8x128xi32> to vector<8x128x1xi32>
    %40 = vector.shape_cast %39 : vector<8x128x1xi32> to vector<8x128xi32>
    %41 = tpu.dynamic_gather %33[%40] in [1] : vector<8x128xf32>, vector<8x128xi32> -> vector<8x128xf32>
    %c1_i32 = arith.constant 1 : i32
    %42 = vector.broadcast %c1_i32 : i32 to vector<8x128xi32>
    %43 = arith.cmpi eq, %12, %42 : vector<8x128xi32>
    %44 = arith.select %43, %41, %30 : vector<8x128xi1>, vector<8x128xf32>
    %45 = vector.extract_strided_slice %15 {offsets = [2, 0], sizes = [1, 128], strides = [1, 1]} : vector<8x128xf32> to vector<1x128xf32>
    %46 = vector.shape_cast %45 : vector<1x128xf32> to vector<1x128xf32>
    %47 = vector.broadcast %46 : vector<1x128xf32> to vector<8x128xf32>
    %c0_i32_9 = arith.constant 0 : i32
    %48 = vector.broadcast %c0_i32_9 : i32 to vector<8x128xi32>
    %49 = arith.cmpi slt, %14, %48 : vector<8x128xi32>
    %c128_i32_10 = arith.constant 128 : i32
    %50 = vector.broadcast %c128_i32_10 : i32 to vector<8x128xi32>
    %51 = arith.addi %14, %50 : vector<8x128xi32>
    %52 = arith.select %49, %51, %14 : vector<8x128xi1>, vector<8x128xi32>
    %53 = vector.shape_cast %52 : vector<8x128xi32> to vector<8x128x1xi32>
    %54 = vector.shape_cast %53 : vector<8x128x1xi32> to vector<8x128xi32>
    %55 = tpu.dynamic_gather %47[%54] in [1] : vector<8x128xf32>, vector<8x128xi32> -> vector<8x128xf32>
    %c2_i32 = arith.constant 2 : i32
    %56 = vector.broadcast %c2_i32 : i32 to vector<8x128xi32>
    %57 = arith.cmpi eq, %12, %56 : vector<8x128xi32>
    %58 = arith.select %57, %55, %44 : vector<8x128xi1>, vector<8x128xf32>
    %59 = vector.extract_strided_slice %15 {offsets = [3, 0], sizes = [1, 128], strides = [1, 1]} : vector<8x128xf32> to vector<1x128xf32>
    %60 = vector.shape_cast %59 : vector<1x128xf32> to vector<1x128xf32>
    %61 = vector.broadcast %60 : vector<1x128xf32> to vector<8x128xf32>
    %c0_i32_11 = arith.constant 0 : i32
    %62 = vector.broadcast %c0_i32_11 : i32 to vector<8x128xi32>
    %63 = arith.cmpi slt, %14, %62 : vector<8x128xi32>
    %c128_i32_12 = arith.constant 128 : i32
    %64 = vector.broadcast %c128_i32_12 : i32 to vector<8x128xi32>
    %65 = arith.addi %14, %64 : vector<8x128xi32>
    %66 = arith.select %63, %65, %14 : vector<8x128xi1>, vector<8x128xi32>
    %67 = vector.shape_cast %66 : vector<8x128xi32> to vector<8x128x1xi32>
    %68 = vector.shape_cast %67 : vector<8x128x1xi32> to vector<8x128xi32>
    %69 = tpu.dynamic_gather %61[%68] in [1] : vector<8x128xf32>, vector<8x128xi32> -> vector<8x128xf32>
    %c3_i32 = arith.constant 3 : i32
    %70 = vector.broadcast %c3_i32 : i32 to vector<8x128xi32>
    %71 = arith.cmpi eq, %12, %70 : vector<8x128xi32>
    %72 = arith.select %71, %69, %58 : vector<8x128xi1>, vector<8x128xf32>
    %73 = vector.extract_strided_slice %15 {offsets = [4, 0], sizes = [1, 128], strides = [1, 1]} : vector<8x128xf32> to vector<1x128xf32>
    %74 = vector.shape_cast %73 : vector<1x128xf32> to vector<1x128xf32>
    %75 = vector.broadcast %74 : vector<1x128xf32> to vector<8x128xf32>
    %c0_i32_13 = arith.constant 0 : i32
    %76 = vector.broadcast %c0_i32_13 : i32 to vector<8x128xi32>
    %77 = arith.cmpi slt, %14, %76 : vector<8x128xi32>
    %c128_i32_14 = arith.constant 128 : i32
    %78 = vector.broadcast %c128_i32_14 : i32 to vector<8x128xi32>
    %79 = arith.addi %14, %78 : vector<8x128xi32>
    %80 = arith.select %77, %79, %14 : vector<8x128xi1>, vector<8x128xi32>
    %81 = vector.shape_cast %80 : vector<8x128xi32> to vector<8x128x1xi32>
    %82 = vector.shape_cast %81 : vector<8x128x1xi32> to vector<8x128xi32>
    %83 = tpu.dynamic_gather %75[%82] in [1] : vector<8x128xf32>, vector<8x128xi32> -> vector<8x128xf32>
    %c4_i32 = arith.constant 4 : i32
    %84 = vector.broadcast %c4_i32 : i32 to vector<8x128xi32>
    %85 = arith.cmpi eq, %12, %84 : vector<8x128xi32>
    %86 = arith.select %85, %83, %72 : vector<8x128xi1>, vector<8x128xf32>
    %87 = vector.extract_strided_slice %15 {offsets = [5, 0], sizes = [1, 128], strides = [1, 1]} : vector<8x128xf32> to vector<1x128xf32>
    %88 = vector.shape_cast %87 : vector<1x128xf32> to vector<1x128xf32>
    %89 = vector.broadcast %88 : vector<1x128xf32> to vector<8x128xf32>
    %c0_i32_15 = arith.constant 0 : i32
    %90 = vector.broadcast %c0_i32_15 : i32 to vector<8x128xi32>
    %91 = arith.cmpi slt, %14, %90 : vector<8x128xi32>
    %c128_i32_16 = arith.constant 128 : i32
    %92 = vector.broadcast %c128_i32_16 : i32 to vector<8x128xi32>
    %93 = arith.addi %14, %92 : vector<8x128xi32>
    %94 = arith.select %91, %93, %14 : vector<8x128xi1>, vector<8x128xi32>
    %95 = vector.shape_cast %94 : vector<8x128xi32> to vector<8x128x1xi32>
    %96 = vector.shape_cast %95 : vector<8x128x1xi32> to vector<8x128xi32>
    %97 = tpu.dynamic_gather %89[%96] in [1] : vector<8x128xf32>, vector<8x128xi32> -> vector<8x128xf32>
    %c5_i32 = arith.constant 5 : i32
    %98 = vector.broadcast %c5_i32 : i32 to vector<8x128xi32>
    %99 = arith.cmpi eq, %12, %98 : vector<8x128xi32>
    %100 = arith.select %99, %97, %86 : vector<8x128xi1>, vector<8x128xf32>
    %101 = vector.extract_strided_slice %15 {offsets = [6, 0], sizes = [1, 128], strides = [1, 1]} : vector<8x128xf32> to vector<1x128xf32>
    %102 = vector.shape_cast %101 : vector<1x128xf32> to vector<1x128xf32>
    %103 = vector.broadcast %102 : vector<1x128xf32> to vector<8x128xf32>
    %c0_i32_17 = arith.constant 0 : i32
    %104 = vector.broadcast %c0_i32_17 : i32 to vector<8x128xi32>
    %105 = arith.cmpi slt, %14, %104 : vector<8x128xi32>
    %c128_i32_18 = arith.constant 128 : i32
    %106 = vector.broadcast %c128_i32_18 : i32 to vector<8x128xi32>
    %107 = arith.addi %14, %106 : vector<8x128xi32>
    %108 = arith.select %105, %107, %14 : vector<8x128xi1>, vector<8x128xi32>
    %109 = vector.shape_cast %108 : vector<8x128xi32> to vector<8x128x1xi32>
    %110 = vector.shape_cast %109 : vector<8x128x1xi32> to vector<8x128xi32>
    %111 = tpu.dynamic_gather %103[%110] in [1] : vector<8x128xf32>, vector<8x128xi32> -> vector<8x128xf32>
    %c6_i32 = arith.constant 6 : i32
    %112 = vector.broadcast %c6_i32 : i32 to vector<8x128xi32>
    %113 = arith.cmpi eq, %12, %112 : vector<8x128xi32>
    %114 = arith.select %113, %111, %100 : vector<8x128xi1>, vector<8x128xf32>
    %115 = vector.extract_strided_slice %15 {offsets = [7, 0], sizes = [1, 128], strides = [1, 1]} : vector<8x128xf32> to vector<1x128xf32>
    %116 = vector.shape_cast %115 : vector<1x128xf32> to vector<1x128xf32>
    %117 = vector.broadcast %116 : vector<1x128xf32> to vector<8x128xf32>
    %c0_i32_19 = arith.constant 0 : i32
    %118 = vector.broadcast %c0_i32_19 : i32 to vector<8x128xi32>
    %119 = arith.cmpi slt, %14, %118 : vector<8x128xi32>
    %c128_i32_20 = arith.constant 128 : i32
    %120 = vector.broadcast %c128_i32_20 : i32 to vector<8x128xi32>
    %121 = arith.addi %14, %120 : vector<8x128xi32>
    %122 = arith.select %119, %121, %14 : vector<8x128xi1>, vector<8x128xi32>
    %123 = vector.shape_cast %122 : vector<8x128xi32> to vector<8x128x1xi32>
    %124 = vector.shape_cast %123 : vector<8x128x1xi32> to vector<8x128xi32>
    %125 = tpu.dynamic_gather %117[%124] in [1] : vector<8x128xf32>, vector<8x128xi32> -> vector<8x128xf32>
    %c7_i32_21 = arith.constant 7 : i32
    %126 = vector.broadcast %c7_i32_21 : i32 to vector<8x128xi32>
    %127 = arith.cmpi eq, %12, %126 : vector<8x128xi32>
    %128 = arith.select %127, %125, %114 : vector<8x128xi1>, vector<8x128xf32>
    %c0_22 = arith.constant 0 : index
    %c0_23 = arith.constant 0 : index
    %129 = vector.load %arg3[%c0_22, %c0_23] : memref<8x128xf32, #tpu.memory_space<vmem>>, vector<8x128xf32>
    tpu.vector_store %arg3[%c0_22, %c0_23], %128 {strides = array<i32>} : memref<8x128xf32, #tpu.memory_space<vmem>>, vector<8x128xf32>,
    return
  }
  func.func @transform_0(%arg0: i32) -> (i32, i32) {
    %c0_i32 = arith.constant 0 : i32
    %c0_i32_0 = arith.constant 0 : i32
    return %arg0, %c0_i32 : i32, i32
  }
  func.func @transform_1(%arg0: i32) -> (i32, i32) {
    %c0_i32 = arith.constant 0 : i32
    %c0_i32_0 = arith.constant 0 : i32
    %c0_i32_1 = arith.constant 0 : i32
    return %c0_i32, %c0_i32_0 : i32, i32
  }
  func.func @transform_2(%arg0: i32) -> (i32, i32) {
    %c0_i32 = arith.constant 0 : i32
    %c0_i32_0 = arith.constant 0 : i32
    return %arg0, %c0_i32 : i32, i32
  }
}

</mosaic_0001>

<bundles_post_ra>
// kernel: tpu_custom_call.1
= control target key start
LH: loop header
LB: loop body
LE: loop exit
PB: predicated region body
PF: predicated region fallthrough
CT: control target
= control target key end

     0   :  { %7 = vsyncpa [#allocation3], 0  ;;  %s781_s0 = inlined_call_operand.hbm [shape: f32[16,128], index: 0, kind: input, shape index: {}]   ;;  %s782_s1 = inlined_call_operand.hbm [shape: f32[8,128], index: 1, kind: input, shape index: {}]   ;;  %s783_s2 = inlined_call_operand.hbm [shape: f32[16,128], index: 2, kind: output, shape index: {}]  }
   0x1   :  { %9 = vsyncpa [#allocation3 + $0x1], 0 }
   0x2   :  { %10 = vsyncpa [#allocation6], 0 }
   0x3   :  { %11 = vsyncpa [#allocation4], 0 }
   0x4   :  { %13 = vsyncpa [#allocation4 + $0x1], 0  ;;  %s576_s9 = smov 0   ;;  %s578_s10 = smov 0  }
   0x5   :  { %s580_s11 = smov 0   ;;  %s582_s12 = smov 0  }
   0x6 LB: > { %s597_s13 = sadd.s32 4294967295, %s556_s12   ;;  %s352_s14 = sadd.s32 4294967294, %s556_s12   ;;  %s556_s12 = sphi %s582_s12, %s807_s12   ;;  %s552_s11 = sphi %s580_s11, %s806_s11   ;;  %s548_s10 = sphi %s578_s10, %s805_s10   ;;  %s544_s9 = sphi %s576_s9, %s804_s9  }
   0x7   : > { %p39_p0 = scmp.ne.s32.totalorder %s548_s10, %s544_s9  ;;  %p784_p1 = scmp.eq.s32.totalorder %s597_s13, 0 }
   0x8   : > { %p90_p3 = scmp.eq.s32.totalorder %s352_s14, 1  ;;  %p353_p5 = scmp.ge.s32.totalorder %s556_s12, 1 }
   0x9   : > { %p606_p4 = por %p784_p1, %p39_p0  ;;  %p97_p7 = scmp.lt.s32.totalorder %s556_s12, 3 }
   0xa   : > { %p611_p6 = por %p90_p3, %p39_p0  ;;  %s558_s18 = smov [#allocation5]  }
   0xb   : > { %s787_s15 = scalar_select %p606_p4, 1, 0 }
   0xc   : > { %s788_s16 = scalar_select %p611_p6, 1, 0 }
   0xd   : > { %p616_p8 = pnand %p353_p5, %p97_p7  ;;  %s110_s19 = sshll.u32 %s558_s18, 4  ;;  %s111_s19 = int_to_ptr.vmem [resolvable:$true] %s110_s19 }
   0xe   : > { %s624_s20 = sadd.s32 1, %s556_s12   ;;  %s26_s24 = sadd.s32 1, %s552_s11 }
   0xf   : > { %s789_s17 = scalar_select %p616_p8, 1, 0 }
  0x10   : > { %p377_p10 = pneg %p616_p8  ;;  %s23_s22 = ssub.s32 %s556_s12, %s624_s20 }
  0x11   : > { %p634_p12 = scmp.eq.s32.totalorder %s23_s22, 0  ;;  %s428_s27 = scalar_lea.hbm %s782_s1, 128 }
  0x12   : > { %p628_p11 = pnand %p377_p10, %p784_p1  ;;  %p429_p0 = scmp.ne.s32.totalorder %s782_s1, %s428_s27 }
  0x13   : > { %s791_s23 = scalar_select %p634_p12, 1, 0 }
  0x14   : > { %p430_p3 = pneg %p628_p11  ;;  %p435_p10 = scmp.lt.u32.totalorder %s428_s27, %s782_s1 }
  0x16   : > { %p431_p5 = pnand %p430_p3, %p429_p0 }
  0x18   : > { %p432_p7 = pneg %p431_p5 }
  0x1a   : > { %p437_p9 = pnand %p435_p10, %p432_p7 }
  0x1c   : > { %440 = shalt.err (!%p437_p9)
}
  0x1d   : > { %s441_s4 = scalar_lea.vmem %s111_s19, 128  ;;  %p449_p6 = scmp.lt.s32.totalorder %s111_s19, %s111_s19 }
  0x1e   : > { %p442_p1 = scmp.ne.s32.totalorder %s111_s19, %s441_s4  ;;  %p450_p4 = scmp.lt.s32.totalorder %s441_s4, %s441_s4 }
  0x20   : > { %p444_p2 = pnand %p442_p1, %p430_p3  ;;  %p451_p8 = por %p450_p4, %p449_p6 }
  0x22   : > { %p445_p13 = pneg %p444_p2 }
  0x24   : > { %p452_p12 = pnand %p451_p8, %p445_p13 }
  0x26   : > { %455 = shalt.err (!%p452_p12)
}
  0x27   : > { %380 = dma.hbm_to_vmem [thread:$0]  (!%p628_p11), %s782_s1, 128, %s111_s19, [#allocation6]  }
  0x28   : > { %p792_p1 = scmp.ne.s32.totalorder %s791_s23, 0  ;;  %p34_p2 = scmp.eq.s32.totalorder %s556_s12, 0 }
  0x29   : > { %p793_p4 = scmp.ne.s32.totalorder %s552_s11, %s548_s10  ;;  %p794_p6 = scmp.eq.s32.totalorder %s597_s13, 1 }
  0x2a   : > { %s660_s7 = scalar_select %p792_p1, %s552_s11, %s26_s24  }
  0x2b   : > { %p668_p8 = por %p794_p6, %p793_p4  ;;  %p390_p9 = scmp.lt.s32.totalorder %s556_s12, 2 }
  0x2c   : > { %s121_s14 = sand.u32 1, %s552_s11   ;;  %p796_p12 = pmov %p793_p4 }
  0x2d   : > { %s356_s18 = sshll.u32 %s121_s14, 3  ;;  %s357_s21 = sshll.u32 %s556_s12, 7 }
  0x2e   : > { %p35_p13 = por %p34_p2, %p796_p12  ;;  %s681_s19 = scalar_lea.hbm %s781_s0, %s357_s21 }
  0x2f   : > { %s125_s23 = scalar_lea.vmem [#allocation2], %s356_s18  ;;  %s122_s27 = scalar_lea.sflag [#allocation3], %s121_s14 }
  0x30   : > { %s132_s24 = sshll.u32 %s125_s23, 4  ;;  %p683_p11 = pnand %p390_p9, %p35_p13  ;;  %s687_s24 = int_to_ptr.vmem [resolvable:$true] %s132_s24 }
  0x31   : > { %s456_s28 = scalar_lea.hbm %s681_s19, 128  ;;  %s461_s3 = scalar_lea.hbm %s781_s0, 256 }
  0x32   : > { %p457_p0 = scmp.ne.s32.totalorder %s681_s19, %s456_s28  ;;  %p458_p3 = pneg %p683_p11 }
  0x33   : > { %p462_p10 = scmp.lt.u32.totalorder %s681_s19, %s781_s0  ;;  %p463_p1 = scmp.lt.u32.totalorder %s461_s3, %s456_s28 }
  0x34   : > { %p459_p5 = pnand %p458_p3, %p457_p0  ;;  %p465_p4 = scmp.lt.u32.totalorder %s456_s28, %s681_s19 }
  0x35   : > { %p464_p2 = por %p463_p1, %p462_p10 }
  0x36   : > { %p460_p7 = pneg %p459_p5 }
  0x37   : > { %p466_p6 = por %p465_p4, %p464_p2 }
  0x39   : > { %p467_p9 = pnand %p466_p6, %p460_p7 }
  0x3b   : > { %470 = shalt.err (!%p467_p9)
}
  0x3c   : > { %s471_s6 = scalar_lea.vmem %s687_s24, 128  ;;  %s559_s14 = smov [#allocation2]  }
  0x3d   : > { %p472_p12 = scmp.ne.s32.totalorder %s687_s24, %s471_s6  ;;  %s476_s18 = sshll.u32 %s559_s14, 4  ;;  %s477_s18 = int_to_ptr.vmem [resolvable:$false] %s476_s18 }
  0x3e   : > { %s478_s21 = scalar_lea.vmem %s477_s18, 256  ;;  %p479_p5 = scmp.lt.s32.totalorder %s687_s24, %s477_s18 }
  0x3f   : > { %p474_p13 = pnand %p472_p12, %p458_p3  ;;  %p480_p10 = scmp.lt.s32.totalorder %s478_s21, %s471_s6 }
  0x41   : > { %p475_p0 = pneg %p474_p13  ;;  %p481_p1 = por %p480_p10, %p479_p5 }
  0x43   : > { %p482_p2 = pnand %p481_p1, %p475_p0 }
  0x45   : > { %485 = shalt.err (!%p482_p2)
}
  0x46   : > { %384 = dma.hbm_to_vmem [thread:$0]  (!%p683_p11), %s681_s19, 128, %s687_s24, %s122_s27  }
  0x47   : > { %p798_p7 = scmp.ne.s32.totalorder %s789_s17, 0 }
  0x48   : > { %s717_s22 = sand.u32 (!%p798_p7), 1, %s548_s10   ;;  %p799_p3 = scmp.ne.s32.totalorder (!%p798_p7), %s787_s15, 0 }
  0x49   : > { %141 = sbr.rel (%p798_p7) target bundleno = 260 (0x104), region = 28  ;;  %s359_s25 = sshll.u32 (!%p798_p7), %s717_s22, 3 }
  0x4a   : > { %s144_s23 = scalar_lea.sflag (!%p798_p7), [#allocation3], %s717_s22  ;;  %s147_s28 = scalar_lea.vmem (!%p798_p7), [#allocation2], %s359_s25 }
  0x50   : > { %531 = dma.done.wait (%p799_p3), %s144_s23, 128  }
  0x51   : > { %533 = vsyncadd (%p799_p3), %s144_s23, 4294967168  ;;  %p800_p11 = scmp.eq.s32.totalorder %s597_s13, 0 }
  0x53   : > { %535 = dma.done.wait (%p800_p11), [#allocation6], 128   ;;  %p801_p4 = pmov %p800_p11 }
  0x54   : > { %v172_v0 = vld [vmem:[%s147_s28] sm:$0xff]  ;;  %v182_v3 = vlaneseq  ;;  %v181_v12 = vld [vmem:[#allocation5] sm:$0xff]  ;;  %s363_s15 = sshll.u32 %s597_s13, 7  ;;  %s171_s17 = scalar_lea.vmem [#allocation7], %s359_s25 }
  0x55   : > { %537 = vsyncadd (%p801_p4), [#allocation6], 4294967168  ;;  %v173_v1 = vmax.f32 %v172_v0, 0.0  ;;  %s272_s19 = sshll.u32 %s171_s17, 4  ;;  %s737_s27 = scalar_lea.hbm %s783_s2, %s363_s15  ;;  %s739_s19 = int_to_ptr.vmem [resolvable:$true] %s272_s19 }
  0x56   : > { %v183_v6 = vshrl.u32 %v182_v3, 7  ;;  %s259_s13 = scalar_lea.sflag [#allocation4], %s717_s22  ;;  %s486_s29 = scalar_lea.vmem %s739_s19, 128 }
  0x57   : > { %v174_v2 = vmin.f32 %v173_v1, 1.0  ;;  %p487_p6 = scmp.ne.s32.totalorder %s739_s19, %s486_s29  ;;  %s560_s30 = smov [#allocation7]  }
  0x58   : > { %v205_v9 = vsub.s32 2, %v183_v6  ;;  %v184_v10 = vsub.s32 0, %v183_v6  ;;  %v214_v16 = vsub.s32 3, %v183_v6  ;;  %v196_v17 = vsub.s32 1, %v183_v6  ;;  %s490_s3 = sshll.u32 %s560_s30, 4  ;;  %s491_s3 = int_to_ptr.vmem [resolvable:$false] %s490_s3 }
  0x59   : > { %v175_v4 = vmul.f32 1000.0, %v174_v2  ;;  %v232_v20 = vsub.s32 5, %v183_v6  ;;  %v223_v21 = vsub.s32 4, %v183_v6  ;;  %v250_v24 = vsub.s32 7, %v183_v6  ;;  %p488_p9 = pnand %p487_p6, %p668_p8  ;;  %s492_s4 = scalar_lea.vmem %s491_s3, 256 }
  0x5a   : > { %v206_v14 = vrot.slane %v181_v12, %v205_v9  ;;  %v185_v15 = vrot.slane %v181_v12, %v184_v10  ;;  %v215_v18 = vrot.slane %v181_v12, %v214_v16  ;;  %v197_v19 = vrot.slane %v181_v12, %v196_v17  ;;  %p493_p13 = scmp.lt.s32.totalorder %s739_s19, %s491_s3  ;;  %p494_p0 = scmp.lt.s32.totalorder %s492_s4, %s486_s29 }
  0x5b   : > { %v368_v5 = vcvt.f32.s32 %v175_v4  ;;  %v233_v22 = vrot.slane %v181_v12, %v232_v20  ;;  %v224_v23 = vrot.slane %v181_v12, %v223_v21  ;;  %v241_v25 = vsub.s32 6, %v183_v6  ;;  %p489_p12 = pneg %p488_p9 }
  0x5c   : > { %v251_v26 = vrot.slane %v181_v12, %v250_v24  ;;  %p495_p5 = por %p494_p0, %p493_p13 }
  0x5d   : > { %vm177_vm0 = vcmp.lt.s32.totalorder %v368_v5, 1000  ;;  %v242_v27 = vrot.slane %v181_v12, %v241_v25 }
  0x5e   : > { %v178_v7 = vsel %vm177_vm0, %v368_v5, 1000  ;;  %p496_p10 = pnand %p495_p5, %p489_p12 }
  0x5f   : > { %v180_v8 = vand.u32 127, %v178_v7  ;;  %v179_v28 = vshra.s32 %v178_v7, 7 }
  0x61   : > { %vm186_vm1 = vcmp.lt.s32.totalorder %v180_v8, 0  ;;  %v187_v11 = vadd.s32 128, %v180_v8  ;;  %vm192_vm2 = vcmp.eq.s32.totalorder %v179_v28, 0  ;;  %vm201_vm3 = vcmp.eq.s32.totalorder %v179_v28, 1 }
  0x62   : > { %vm210_vm4 = vcmp.eq.s32.totalorder %v179_v28, 2  ;;  %vm219_vm5 = vcmp.eq.s32.totalorder %v179_v28, 3  ;;  %vm228_vm6 = vcmp.eq.s32.totalorder %v179_v28, 4  ;;  %vm237_vm7 = vcmp.eq.s32.totalorder %v179_v28, 5 }
  0x63   : > { %v188_v13 = vsel %vm186_vm1, %v187_v11, %v180_v8  ;;  %vm246_vm8 = vcmp.eq.s32.totalorder %v179_v28, 6  ;;  %vm255_vm9 = vcmp.eq.s32.totalorder %v179_v28, 7 }
  0x64   : > { %427 = vset.pattern.permute.xlu1 %v188_v13  ;;  %426 = vset.pattern.permute.xlu0 %v188_v13 }
  0x68   : > { %208 = vperm.xlu1 %427, %v206_v14   ;;  %190 = vperm.xlu0 %426, %v185_v15  }
  0x6c   : > { %217 = vperm.xlu1 %427, %v215_v18   ;;  %199 = vperm.xlu0 %426, %v197_v19  }
  0x70   : > { %235 = vperm.xlu1 %427, %v233_v22   ;;  %226 = vperm.xlu0 %426, %v224_v23  }
  0x74   : > { %253 = vperm.xlu1 %427, %v251_v26   ;;  %244 = vperm.xlu0 %426, %v242_v27  }
  0xe7   : > { %v209_v29 = vpop.permute.xlu1 %208  ;;  %v191_v30 = vpop.permute.xlu0 %190 }
  0xe8   : > { %v193_v31 = vsel %vm192_vm2, %v191_v30, 0.0 }
  0xeb   : > { %v218_v32 = vpop.permute.xlu1 %217  ;;  %v200_v33 = vpop.permute.xlu0 %199 }
  0xec   : > { %v202_v34 = vsel %vm201_vm3, %v200_v33, %v193_v31 }
  0xed   : > { %v211_v35 = vsel %vm210_vm4, %v209_v29, %v202_v34 }
  0xee   : > { %v220_v36 = vsel %vm219_vm5, %v218_v32, %v211_v35 }
  0xef   : > { %v236_v37 = vpop.permute.xlu1 %235  ;;  %v227_v38 = vpop.permute.xlu0 %226 }
  0xf0   : > { %v229_v39 = vsel %vm228_vm6, %v227_v38, %v220_v36 }
  0xf1   : > { %v238_v42 = vsel %vm237_vm7, %v236_v37, %v229_v39 }
  0xf3   : > { %v254_v40 = vpop.permute.xlu1 %253  ;;  %v245_v41 = vpop.permute.xlu0 %244 }
  0xf4   : > { %v247_v43 = vsel %vm246_vm8, %v245_v41, %v238_v42 }
  0xf5   : > { %v256_v44 = vsel %vm255_vm9, %v254_v40, %v247_v43 }
  0xf6   : > { %257 = vst [vmem:[%s171_s17] sm:$0xff] %v256_v44 }
  0xf7   : > { %499 = shalt.err (!%p496_p10)
}
  0xf8   : > { %s500_s5 = scalar_lea.hbm %s737_s27, 128  ;;  %s504_s18 = scalar_lea.hbm %s783_s2, 256 }
  0xf9   : > { %p501_p1 = scmp.ne.s32.totalorder %s737_s27, %s500_s5  ;;  %p505_p3 = scmp.lt.u32.totalorder %s737_s27, %s783_s2 }
  0xfa   : > { %p506_p11 = scmp.lt.u32.totalorder %s504_s18, %s500_s5  ;;  %p508_p6 = scmp.lt.u32.totalorder %s500_s5, %s737_s27 }
  0xfb   : > { %p502_p2 = pnand %p501_p1, %p668_p8 }
  0xfc   : > { %p507_p4 = por %p506_p11, %p505_p3 }
  0xfd   : > { %p503_p7 = pneg %p502_p2 }
  0xfe   : > { %p509_p9 = por %p508_p6, %p507_p4 }
 0x100   : > { %p510_p12 = pnand %p509_p9, %p503_p7 }
 0x102   : > { %513 = shalt.err (!%p510_p12)
}
 0x103   : > { %375 = dma.vmem_to_hbm [thread:$0]  (%p668_p8), %s739_s19, 128, %s737_s27, %s259_s13  }
 0x104 PF: > { %s284_s25 = sand.u32 1, %s544_s9   ;;  %p802_p13 = scmp.ne.s32.totalorder %s788_s16, 0 }
 0x105   : > { %p803_p0 = scmp.ge.s32.totalorder %s556_s12, 2  ;;  %s285_s23 = scalar_lea.sflag [#allocation4], %s284_s25 }
 0x107   : > { %p386_p5 = pnand %p803_p0, %p802_p13 }
 0x109   : > { %539 = dma.done.wait (!%p386_p5), %s285_s23, 128  }
 0x10a   : > { %541 = vsyncadd (!%p386_p5), %s285_s23, 4294967168  ;;  %p16_p10 = scmp.ge.s32.totalorder %s624_s20, 4   ;;  %s804_s9 = smov %s548_s10 }
 0x10b   : > { %s805_s10 = smov %s552_s11  ;;  %s806_s11 = smov %s660_s7 }
 0x10c   : > { %s807_s12 = smov %s624_s20  ;;  %18 = sbr.rel (!%p16_p10) target bundleno = 6 (0x6), region = 77 }
 0x113   :  { %290 = vsyncpa [#allocation3], 1 }
 0x114   :  { %292 = vsyncpa [#allocation3 + $0x1], 1 }
 0x115   :  { %293 = vsyncpa [#allocation6], 1 }
 0x116   :  { %294 = vsyncpa [#allocation4], 1 }
 0x117   :  { %296 = vsyncpa [#allocation4 + $0x1], 1 }

</bundles_post_ra>
